<compile_context>
chip_gen: v6e
topology: v6e:2x2x1
jax: 0.10.0
libtpu: 0.0.40
codegen_flags: <defaults>
</compile_context>

<pallas_src>
import jax
import jax.numpy as jnp
from jax.experimental import pallas as pl
from jax.experimental.pallas import tpu as pltpu


def _round_up(x, m):
    return ((x + m - 1) // m) * m


# ----------------------------------------------------------------------------
# Kernel: one batch tile per grid step, everything in (feature, batch) layout.
# ----------------------------------------------------------------------------
def deepfm_kernel(xT_ref, fmw_ref, v2sh_ref, fusedT_ref, b1_ref,
                  w2T_ref, b2_ref, wf_ref, bias_ref, out_ref):
    xT = xT_ref[...]                                         # (F_pad, TB) f32

    # --- fused first-layer matmul: [w1 | fm_v]^T @ x -> (H1_pad + K, TB) ----
    z = jnp.dot(fusedT_ref[...], xT, preferred_element_type=jnp.float32)
    h1_dim = b1_ref.shape[0]                                 # static, multiple of 8
    h1 = jnp.maximum(z[:h1_dim, :] + b1_ref[...], 0.0)       # (H1_pad, TB)
    xv = z[h1_dim:, :]                                       # (K,      TB)

    # --- FM (wide) path: single fused VPU pass + sublane reductions ---------
    # wide = sum_f x_f*(w_f - 0.5*v2sum_f*x_f) + 0.5*sum_k (xV)_k^2
    wide = jnp.sum(xT * (fmw_ref[...] - xT * v2sh_ref[...]),
                   axis=0, keepdims=True)                                  # (1,TB)
    wide = wide + 0.5 * jnp.sum(xv * xv, axis=0, keepdims=True)            # (1,TB)

    # --- DNN (deep) path -----------------------------------------------------
    h2 = jnp.dot(w2T_ref[...], h1, preferred_element_type=jnp.float32) + b2_ref[...]
    h2 = jnp.maximum(h2, 0.0)                                              # (H2,TB)
    deep = jnp.sum(h2 * wf_ref[...], axis=0, keepdims=True)                # (1,TB)

    logit = wide + deep + bias_ref[0, 0]                     # scalar bias via SMEM
    out_ref[...] = jax.nn.sigmoid(logit) * 5.0               # lane-dense (1,TB) store


# ----------------------------------------------------------------------------
# One-time weight preparation (hoisted out of the per-batch forward).
# ----------------------------------------------------------------------------
def prepare_weights(params, f_pad, h1_pad):
    F = params["fm_w"].shape[0]
    H1 = params["w1"].shape[1]

    fm_w = jnp.pad(params["fm_w"], ((0, f_pad - F), (0, 0)))                 # (F_pad, 1)
    v2s_half = 0.5 * jnp.sum(params["fm_v"] * params["fm_v"], axis=1,
                             keepdims=True)
    v2s_half = jnp.pad(v2s_half, ((0, f_pad - F), (0, 0)))                    # (F_pad, 1)
    w1T = jnp.pad(params["w1"].T, ((0, h1_pad - H1), (0, f_pad - F)))         # (H1_pad, F_pad)
    fmvT = jnp.pad(params["fm_v"].T, ((0, 0), (0, f_pad - F)))                # (K, F_pad)
    fusedT = jnp.concatenate([w1T, fmvT], axis=0)                             # (H1_pad+K, F_pad)
    b1_col = jnp.pad(params["b1"].T, ((0, h1_pad - H1), (0, 0)))              # (H1_pad, 1)
    w2T = jnp.pad(params["w2"].T, ((0, 0), (0, h1_pad - H1)))                 # (H2, H1_pad)
    b2_col = params["b2"].T                                                   # (H2, 1)
    wf_col = params["wf"]                                                     # (H2, 1)
    bias = (params["fm_b"] + params["bf"]).reshape(1, 1)                      # (1, 1)
    return dict(fm_w=fm_w, v2s_half=v2s_half, fusedT=fusedT, b1=b1_col,
                w2T=w2T, b2=b2_col, wf=wf_col, bias=bias)


# ----------------------------------------------------------------------------
# Feature builder: embedding gather + concat directly in (F_pad, B_pad) layout.
# ----------------------------------------------------------------------------
def build_features_T(x_raw, emb_tables, n_sparse, f_pad, b_pad):
    B = x_raw.shape[0]
    sparse_idx = x_raw[:, :n_sparse].astype(jnp.int32)        # (B, n_sparse)
    # gather with batch already on the lane axis: (K, B) per sparse feature
    embeds_T = [jnp.take(emb_tables[i].T, sparse_idx[:, i], axis=1)
                for i in range(n_sparse)]
    dense_T = x_raw[:, n_sparse:].T                            # (n_dense, B)
    xT = jnp.concatenate(embeds_T + [dense_T], axis=0).astype(jnp.float32)
    return jnp.pad(xT, ((0, f_pad - xT.shape[0]), (0, b_pad - B)))


def _choose_tile_b(B, f_pad):
    if B <= 256:
        return 128                                    # tiny demo batches: one tile
    # target ~2 MiB per streamed f32 (F_pad, tile_b) block, clamped [512, 4096]
    target = (2 * 1024 * 1024) // (f_pad * 4)
    tile_b = max(512, min(4096, target))
    tile_b = (tile_b // 128) * 128
    # keep >= 8 grid steps when the batch allows (v7x megacore + pipelining)
    while tile_b > 512 and pl.cdiv(B, tile_b) < 8:
        tile_b //= 2
    return tile_b


# ----------------------------------------------------------------------------
# pallas_call wrapper.
# ----------------------------------------------------------------------------
def deepfm_pallas(xT, prep, tile_b):
    f_pad, b_pad = xT.shape
    num_tiles = b_pad // tile_b
    H1p = prep["b1"].shape[0]
    H2 = prep["w2T"].shape[0]
    K = prep["fusedT"].shape[0] - H1p

    operands = [xT, prep["fm_w"], prep["v2s_half"], prep["fusedT"], prep["b1"],
                prep["w2T"], prep["b2"], prep["wf"], prep["bias"]]

    def resident(shape):
        # Weight stays VMEM-resident across the whole grid (constant block idx).
        return pl.BlockSpec(shape, lambda i: (0, 0))

    in_specs = [
        pl.BlockSpec((f_pad, tile_b), lambda i: (0, i)),       # streamed x^T
        resident(prep["fm_w"].shape),
        resident(prep["v2s_half"].shape),
        resident(prep["fusedT"].shape),
        resident(prep["b1"].shape),
        resident(prep["w2T"].shape),
        resident(prep["b2"].shape),
        resident(prep["wf"].shape),
        pl.BlockSpec(memory_space=pltpu.MemorySpace.SMEM),     # scalar bias
    ]
    out_spec = pl.BlockSpec((1, tile_b), lambda i: (0, i))     # lane-dense row

    weight_bytes = sum(int(o.size) * o.dtype.itemsize for o in operands[1:])
    stream_bytes = int(xT.size) * 4 + b_pad * 4
    # double-buffered streamed block + resident weights + headroom; v7x-safe cap
    block_bytes = 2 * (f_pad * tile_b * 4) + weight_bytes + 2 * tile_b * 4
    vmem_limit = min(48 * 1024 * 1024, max(16 * 1024 * 1024, 4 * block_bytes))

    flops = 2 * b_pad * (f_pad * (H1p + K) + H1p * H2) \
        + 10 * b_pad * f_pad + 4 * b_pad * H2

    out_row = pl.pallas_call(
        deepfm_kernel,
        grid=(num_tiles,),
        in_specs=in_specs,
        out_specs=out_spec,
        out_shape=jax.ShapeDtypeStruct((1, b_pad), jnp.float32),
        compiler_params=pltpu.CompilerParams(
            dimension_semantics=("parallel",),          # megacore on v7x
            vmem_limit_bytes=vmem_limit,
        ),
        cost_estimate=pl.CostEstimate(
            flops=flops, transcendentals=b_pad,
            bytes_accessed=stream_bytes + weight_bytes),
    )(*operands)
    return out_row


def make_deepfm_forward(params, n_sparse, *, tile_b=None):
    """Hoists one-time weight prep; returns a per-batch forward function."""
    F = params["fm_w"].shape[0]
    H1 = params["w1"].shape[1]
    f_pad = _round_up(F, 8)
    h1_pad = _round_up(H1, 8)
    prep = prepare_weights(params, f_pad, h1_pad)      # computed once
    emb = params["emb"]

    def forward(x_raw):
        B = x_raw.shape[0]
        tb = tile_b if tile_b is not None else _choose_tile_b(B, f_pad)
        num_tiles = pl.cdiv(B, tb)
        b_pad = num_tiles * tb
        xT = build_features_T(x_raw, emb, n_sparse, f_pad, b_pad)
        out_row = deepfm_pallas(xT, prep, tb)
        return out_row[0, :B].reshape(B, 1)

    return forward


# ----------------------------------------------------------------------------
# Parameter init + pure-JAX reference (for the correctness check).
# ----------------------------------------------------------------------------
def make_params(key, n_sparse, n_vocab, embed_dim, n_dense, hidden):
    """Deterministic synthetic parameter initialization (no checkpoint load)."""
    feature_num = n_dense + n_sparse * embed_dim
    dims = [feature_num] + hidden                      # mirrors hidden.insert(0, feature_num)
    ks = jax.random.split(key, 16)
    p = {}
    p["emb"] = [
        0.1 * jax.random.normal(ks[i], (n_vocab, embed_dim), jnp.float32)
        for i in range(n_sparse)
    ]
    p["fm_w"] = 0.1 * jax.random.normal(ks[8], (feature_num, 1), jnp.float32)
    p["fm_b"] = 0.01 * jnp.ones((1, 1), jnp.float32)
    p["fm_v"] = 0.1 * jax.random.normal(ks[9], (feature_num, embed_dim), jnp.float32)
    p["w1"] = 0.1 * jax.random.normal(ks[10], (dims[0], dims[1]), jnp.float32)
    p["b1"] = jnp.zeros((1, dims[1]), jnp.float32)
    p["w2"] = 0.1 * jax.random.normal(ks[11], (dims[1], dims[2]), jnp.float32)
    p["b2"] = jnp.zeros((1, dims[2]), jnp.float32)
    p["wf"] = 0.1 * jax.random.normal(ks[12], (dims[2], 1), jnp.float32)
    p["bf"] = jnp.zeros((1, 1), jnp.float32)
    return p


def build_features(x_raw, params, n_sparse):
    """(B, F) feature matrix (reference path only)."""
    sparse_idx = x_raw[:, :n_sparse].astype(jnp.int32)
    dense_in = x_raw[:, n_sparse:]
    embeds = [params["emb"][i][sparse_idx[:, i]] for i in range(n_sparse)]
    sparse_embed = jnp.concatenate(embeds, axis=-1)
    return jnp.concatenate([sparse_embed, dense_in], axis=-1).astype(jnp.float32)


def deepfm_reference(x_feat, params):
    """Plain-JAX f32 reference of the same forward (correctness check)."""
    x = x_feat
    first = x @ params["fm_w"] + params["fm_b"]
    xv = x @ params["fm_v"]
    x2v2 = (x * x) @ (params["fm_v"] * params["fm_v"])
    wide = first + 0.5 * jnp.sum(xv * xv - x2v2, axis=-1, keepdims=True)
    h = jnp.maximum(x @ params["w1"] + params["b1"], 0.0)
    h = jnp.maximum(h @ params["w2"] + params["b2"], 0.0)
    deep = h @ params["wf"] + params["bf"]
    return jax.nn.sigmoid(wide + deep) * 5.0


if __name__ == "__main__":
    key = jax.random.PRNGKey(0)
    k_par, k_idx, k_dense = jax.random.split(key, 3)

    # small synthetic config consistent with the module
    n_sparse, n_vocab, embed_dim = 3, 10, 4
    n_dense = 5
    hidden = [32, 16]
    B = 8

    params = make_params(k_par, n_sparse, n_vocab, embed_dim, n_dense, hidden)

    # raw input: first n_sparse columns are categorical ids stored as floats
    # (the PyTorch module calls .long() on them), rest are dense floats.
    sparse_ids = jax.random.randint(k_idx, (B, n_sparse), 0, n_vocab).astype(jnp.float32)
    dense_vals = jax.random.normal(k_dense, (B, n_dense), jnp.float32)
    x_raw = jnp.concatenate([sparse_ids, dense_vals], axis=-1)   # (B, 8)

    forward = jax.jit(make_deepfm_forward(params, n_sparse))
    out = jax.block_until_ready(forward(x_raw))

    assert out.shape == (B, 1), out.shape
    assert bool(jnp.all(jnp.isfinite(out)))
    assert bool(jnp.all((out >= 0.0) & (out <= 5.0)))

    # numerical check vs. pure-JAX f32 reference (all-f32 kernel: only
    # reassociation-level differences expected).
    ref = deepfm_reference(build_features(x_raw, params, n_sparse), params)
    assert bool(jnp.max(jnp.abs(out - ref)) < 2e-3), jnp.max(jnp.abs(out - ref))

    print("KERNEL_OK")
</pallas_src>

<mosaic_0001>
module attributes {stable_mosaic.version = 11 : i64} {
  func.func @deepfm_kernel(%arg0: i32, %arg1: memref<24x128xf32, #tpu.memory_space<vmem>>, %arg2: memref<24x1xf32, #tpu.memory_space<vmem>>, %arg3: memref<24x1xf32, #tpu.memory_space<vmem>>, %arg4: memref<36x24xf32, #tpu.memory_space<vmem>>, %arg5: memref<32x1xf32, #tpu.memory_space<vmem>>, %arg6: memref<16x32xf32, #tpu.memory_space<vmem>>, %arg7: memref<16x1xf32, #tpu.memory_space<vmem>>, %arg8: memref<16x1xf32, #tpu.memory_space<vmem>>, %arg9: memref<1x1xf32, #tpu.memory_space<smem>>, %arg10: memref<1x128xf32, #tpu.memory_space<vmem>>) attributes {dimension_semantics = [#tpu.dimension_semantics<parallel>], iteration_bounds = array<i64: 1>, scalar_prefetch = 0 : i64, scratch_operands = 0 : i64, tpu.core_type = #tpu.core_type<tc>, window_params = [{transform_indices = @transform_0, window_bounds = array<i64: 24, 128>}, {pipeline_mode = #tpu.pipeline_mode<synchronous>, transform_indices = @transform_1, window_bounds = array<i64: 24, 1>}, {pipeline_mode = #tpu.pipeline_mode<synchronous>, transform_indices = @transform_2, window_bounds = array<i64: 24, 1>}, {pipeline_mode = #tpu.pipeline_mode<synchronous>, transform_indices = @transform_3, window_bounds = array<i64: 36, 24>}, {pipeline_mode = #tpu.pipeline_mode<synchronous>, transform_indices = @transform_4, window_bounds = array<i64: 32, 1>}, {pipeline_mode = #tpu.pipeline_mode<synchronous>, transform_indices = @transform_5, window_bounds = array<i64: 16, 32>}, {pipeline_mode = #tpu.pipeline_mode<synchronous>, transform_indices = @transform_6, window_bounds = array<i64: 16, 1>}, {pipeline_mode = #tpu.pipeline_mode<synchronous>, transform_indices = @transform_7, window_bounds = array<i64: 16, 1>}, {transform_indices = @transform_8, window_bounds = array<i64: 1, 1>}, {transform_indices = @transform_9, window_bounds = array<i64: 1, 128>}]} {
    %c0 = arith.constant 0 : index
    %c0_0 = arith.constant 0 : index
    %0 = vector.load %arg1[%c0, %c0_0] : memref<24x128xf32, #tpu.memory_space<vmem>>, vector<24x128xf32>
    %c0_1 = arith.constant 0 : index
    %c0_2 = arith.constant 0 : index
    %1 = vector.load %arg4[%c0_1, %c0_2] : memref<36x24xf32, #tpu.memory_space<vmem>>, vector<36x24xf32>
    %cst = arith.constant dense<0.000000e+00> : vector<36x128xf32>
    %2 = tpu.matmul %1, %0, %cst {dimension_numbers = #tpu.dot_dimension_numbers<[1], [0], [0], [1], [0, 0, 1, 1], [], []>} : vector<36x24xf32>, vector<24x128xf32>, vector<36x128xf32> -> vector<36x128xf32>
    %3 = vector.extract_strided_slice %2 {offsets = [0, 0], sizes = [32, 128], strides = [1, 1]} : vector<36x128xf32> to vector<32x128xf32>
    %c0_3 = arith.constant 0 : index
    %c0_4 = arith.constant 0 : index
    %4 = vector.load %arg5[%c0_3, %c0_4] : memref<32x1xf32, #tpu.memory_space<vmem>>, vector<32x1xf32>
    %5 = vector.broadcast %4 : vector<32x1xf32> to vector<32x128xf32>
    %6 = arith.addf %3, %5 : vector<32x128xf32>
    %cst_5 = arith.constant 0.000000e+00 : f32
    %7 = vector.broadcast %cst_5 : f32 to vector<32x128xf32>
    %8 = arith.maximumf %6, %7 : vector<32x128xf32>
    %9 = vector.extract_strided_slice %2 {offsets = [32, 0], sizes = [4, 128], strides = [1, 1]} : vector<36x128xf32> to vector<4x128xf32>
    %c0_6 = arith.constant 0 : index
    %c0_7 = arith.constant 0 : index
    %10 = vector.load %arg2[%c0_6, %c0_7] : memref<24x1xf32, #tpu.memory_space<vmem>>, vector<24x1xf32>
    %c0_8 = arith.constant 0 : index
    %c0_9 = arith.constant 0 : index
    %11 = vector.load %arg3[%c0_8, %c0_9] : memref<24x1xf32, #tpu.memory_space<vmem>>, vector<24x1xf32>
    %12 = vector.broadcast %11 : vector<24x1xf32> to vector<24x128xf32>
    %13 = arith.mulf %0, %12 : vector<24x128xf32>
    %14 = vector.broadcast %10 : vector<24x1xf32> to vector<24x128xf32>
    %15 = arith.subf %14, %13 : vector<24x128xf32>
    %16 = arith.mulf %0, %15 : vector<24x128xf32>
    %cst_10 = arith.constant dense<0.000000e+00> : vector<128xf32>
    %17 = vector.multi_reduction <add>, %16, %cst_10 [0] : vector<24x128xf32> to vector<128xf32>
    %18 = vector.shape_cast %17 : vector<128xf32> to vector<1x128xf32>
    %19 = arith.mulf %9, %9 : vector<4x128xf32>
    %cst_11 = arith.constant dense<0.000000e+00> : vector<128xf32>
    %20 = vector.multi_reduction <add>, %19, %cst_11 [0] : vector<4x128xf32> to vector<128xf32>
    %21 = vector.shape_cast %20 : vector<128xf32> to vector<1x128xf32>
    %cst_12 = arith.constant 5.000000e-01 : f32
    %22 = vector.broadcast %cst_12 : f32 to vector<1x128xf32>
    %23 = arith.mulf %22, %21 : vector<1x128xf32>
    %24 = arith.addf %18, %23 : vector<1x128xf32>
    %c0_13 = arith.constant 0 : index
    %c0_14 = arith.constant 0 : index
    %25 = vector.load %arg6[%c0_13, %c0_14] : memref<16x32xf32, #tpu.memory_space<vmem>>, vector<16x32xf32>
    %cst_15 = arith.constant dense<0.000000e+00> : vector<16x128xf32>
    %26 = tpu.matmul %25, %8, %cst_15 {dimension_numbers = #tpu.dot_dimension_numbers<[1], [0], [0], [1], [0, 0, 1, 1], [], []>} : vector<16x32xf32>, vector<32x128xf32>, vector<16x128xf32> -> vector<16x128xf32>
    %c0_16 = arith.constant 0 : index
    %c0_17 = arith.constant 0 : index
    %27 = vector.load %arg7[%c0_16, %c0_17] : memref<16x1xf32, #tpu.memory_space<vmem>>, vector<16x1xf32>
    %28 = vector.broadcast %27 : vector<16x1xf32> to vector<16x128xf32>
    %29 = arith.addf %26, %28 : vector<16x128xf32>
    %cst_18 = arith.constant 0.000000e+00 : f32
    %30 = vector.broadcast %cst_18 : f32 to vector<16x128xf32>
    %31 = arith.maximumf %29, %30 : vector<16x128xf32>
    %c0_19 = arith.constant 0 : index
    %c0_20 = arith.constant 0 : index
    %32 = vector.load %arg8[%c0_19, %c0_20] : memref<16x1xf32, #tpu.memory_space<vmem>>, vector<16x1xf32>
    %33 = vector.broadcast %32 : vector<16x1xf32> to vector<16x128xf32>
    %34 = arith.mulf %31, %33 : vector<16x128xf32>
    %cst_21 = arith.constant dense<0.000000e+00> : vector<128xf32>
    %35 = vector.multi_reduction <add>, %34, %cst_21 [0] : vector<16x128xf32> to vector<128xf32>
    %36 = vector.shape_cast %35 : vector<128xf32> to vector<1x128xf32>
    %37 = arith.addf %24, %36 : vector<1x128xf32>
    %c0_22 = arith.constant 0 : index
    %c0_23 = arith.constant 0 : index
    %38 = memref.load %arg9[%c0_22, %c0_23] : memref<1x1xf32, #tpu.memory_space<smem>>
    %39 = vector.broadcast %38 : f32 to vector<1x128xf32>
    %40 = arith.addf %37, %39 : vector<1x128xf32>
    %41 = arith.negf %40 : vector<1x128xf32>
    %42 = math.exp %41 : vector<1x128xf32>
    %cst_24 = arith.constant 1.000000e+00 : f32
    %43 = vector.broadcast %cst_24 : f32 to vector<1x128xf32>
    %44 = arith.addf %43, %42 : vector<1x128xf32>
    %45 = arith.divf %43, %44 : vector<1x128xf32>
    %cst_25 = arith.constant 5.000000e+00 : f32
    %46 = vector.broadcast %cst_25 : f32 to vector<1x128xf32>
    %47 = arith.mulf %45, %46 : vector<1x128xf32>
    %c0_26 = arith.constant 0 : index
    %c0_27 = arith.constant 0 : index
    %48 = vector.load %arg10[%c0_26, %c0_27] : memref<1x128xf32, #tpu.memory_space<vmem>>, vector<1x128xf32>
    tpu.vector_store %arg10[%c0_26, %c0_27], %47 {strides = array<i32>} : memref<1x128xf32, #tpu.memory_space<vmem>>, vector<1x128xf32>,
    return
  }
  func.func @transform_0(%arg0: i32) -> (i32, i32) {
    %c0_i32 = arith.constant 0 : i32
    %c0_i32_0 = arith.constant 0 : i32
    return %c0_i32, %arg0 : i32, i32
  }
  func.func @transform_1(%arg0: i32) -> (i32, i32) {
    %c0_i32 = arith.constant 0 : i32
    %c0_i32_0 = arith.constant 0 : i32
    %c0_i32_1 = arith.constant 0 : i32
    return %c0_i32, %c0_i32_0 : i32, i32
  }
  func.func @transform_2(%arg0: i32) -> (i32, i32) {
    %c0_i32 = arith.constant 0 : i32
    %c0_i32_0 = arith.constant 0 : i32
    %c0_i32_1 = arith.constant 0 : i32
    return %c0_i32, %c0_i32_0 : i32, i32
  }
  func.func @transform_3(%arg0: i32) -> (i32, i32) {
    %c0_i32 = arith.constant 0 : i32
    %c0_i32_0 = arith.constant 0 : i32
    %c0_i32_1 = arith.constant 0 : i32
    return %c0_i32, %c0_i32_0 : i32, i32
  }
  func.func @transform_4(%arg0: i32) -> (i32, i32) {
    %c0_i32 = arith.constant 0 : i32
    %c0_i32_0 = arith.constant 0 : i32
    %c0_i32_1 = arith.constant 0 : i32
    return %c0_i32, %c0_i32_0 : i32, i32
  }
  func.func @transform_5(%arg0: i32) -> (i32, i32) {
    %c0_i32 = arith.constant 0 : i32
    %c0_i32_0 = arith.constant 0 : i32
    %c0_i32_1 = arith.constant 0 : i32
    return %c0_i32, %c0_i32_0 : i32, i32
  }
  func.func @transform_6(%arg0: i32) -> (i32, i32) {
    %c0_i32 = arith.constant 0 : i32
    %c0_i32_0 = arith.constant 0 : i32
    %c0_i32_1 = arith.constant 0 : i32
    return %c0_i32, %c0_i32_0 : i32, i32
  }
  func.func @transform_7(%arg0: i32) -> (i32, i32) {
    %c0_i32 = arith.constant 0 : i32
    %c0_i32_0 = arith.constant 0 : i32
    %c0_i32_1 = arith.constant 0 : i32
    return %c0_i32, %c0_i32_0 : i32, i32
  }
  func.func @transform_8(%arg0: i32) -> (i32, i32) {
    %c0_i32 = arith.constant 0 : i32
    %c0_i32_0 = arith.constant 0 : i32
    %c0_i32_1 = arith.constant 0 : i32
    return %c0_i32, %c0_i32_0 : i32, i32
  }
  func.func @transform_9(%arg0: i32) -> (i32, i32) {
    %c0_i32 = arith.constant 0 : i32
    %c0_i32_0 = arith.constant 0 : i32
    return %c0_i32, %arg0 : i32, i32
  }
}

</mosaic_0001>

<bundles_post_ra>
// kernel: forward.1
= control target key start
LH: loop header
LB: loop body
LE: loop exit
PB: predicated region body
PF: predicated region fallthrough
CT: control target
= control target key end

     0   :  { %v447_v0 = vmov 0.0   ;;  %vm41_vm0 = vcmask 195584   ;;  %vm448_vm1 = vmmov 0   ;;  %v449_v10 = vmov 0   ;;  %s608_s0 = inlined_call_operand.vmem [shape: f32[24,128], index: 0, kind: input, shape index: {}]   ;;  %s609_s3 = inlined_call_operand.vmem [shape: f32[36,24], index: 3, kind: input, shape index: {}]   ;;  %s610_s4 = inlined_call_operand.vmem [shape: f32[32,1], index: 4, kind: input, shape index: {}]   ;;  %s611_s2 = inlined_call_operand.vmem [shape: f32[24,1], index: 2, kind: input, shape index: {}]   ;;  %s612_s1 = inlined_call_operand.vmem [shape: f32[24,1], index: 1, kind: input, shape index: {}]   ;;  %s613_s6 = inlined_call_operand.vmem [shape: f32[16,1], index: 6, kind: input, shape index: {}]   ;;  %s614_s7 = inlined_call_operand.vmem [shape: f32[16,1], index: 7, kind: input, shape index: {}]   ;;  %s615_s5 = inlined_call_operand.vmem [shape: f32[16,32], index: 5, kind: input, shape index: {}]   ;;  %s616_s8 = inlined_call_operand.<no memory space> [shape: f32[1,1], index: 8, kind: input, shape index: {}]   ;;  %s617_s9 = inlined_call_operand.vmem [shape: f32[1,128], index: 9, kind: output, shape index: {}]  }
   0x1   :  { %400 = vmatprep.subr.mxu0 %v447_v0  ;;  %432 = vmatprep.subr.mxu1 %v447_v0  ;;  %v503_v1 = vld [vmem:[%s608_s0 + $0x10] sm:$0xff]  ;;  %v508_v2 = vld [vmem:[%s608_s0 + $0x8] sm:$0xff]  ;;  %v515_v3 = vld [vmem:[%s608_s0] sm:$0xff]  ;;  %vm257_vm2 = vcmask 261120   ;;  %vm233_vm3 = vcmask 1043456  }
   0x2   :  { %401 = vmatpush3.msra.mxu0 %v503_v1  ;;  %435 = vmatpush3.msra.mxu1 %v503_v1  ;;  %v36_v4 = vld [vmem:[%s609_s3] sm:$0xff]  ;;  %v39_v5 = vld [vmem:[%s609_s3 + $0x18] sm:$0xff]  ;;  %v148_v7 = vld [vmem:[%s610_s4 + $0x8] sm:$0xff] }
   0x3   :  { %402 = vmatprep.subr.mxu0 %v447_v0  ;;  %433 = vmatprep.subr.mxu1 %v447_v0  ;;  %v150_v6 = vld [vmem:[%s610_s4 + $0x18] sm:$0xff]  ;;  %v37_v8 = vld [vmem:[%s609_s3 + $0x8] sm:$0xff]  ;;  %v40_v9 = vld [vmem:[%s609_s3 + $0x20] sm:$0xf] }
   0x4   :  { %403 = vmatpush3.msra.mxu0 %v508_v2  ;;  %436 = vmatpush3.msra.mxu1 %v508_v2  ;;  %v149_v11 = vld [vmem:[%s610_s4 + $0x10] sm:$0xff]  ;;  %v147_v12 = vld [vmem:[%s610_s4] sm:$0xff]  ;;  %v183_v15 = vld [vmem:[%s611_s2 + $0x8] sm:$0xff] }
   0x5   :  { %404 = vmatprep.subr.mxu0 %v447_v0  ;;  %434 = vmatprep.subr.mxu1 %v447_v0  ;;  %v38_v13 = vld [vmem:[%s609_s3 + $0x10] sm:$0xff]  ;;  %v182_v14 = vld [vmem:[%s611_s2] sm:$0xff]  ;;  %v180_v18 = vld [vmem:[%s612_s1 + $0x8] sm:$0xff] }
   0x6   :  { %405 = vmatpush3.msra.mxu0 %v515_v3  ;;  %437 = vmatpush3.msra.mxu1 %v515_v3  ;;  %v184_v16 = vld [vmem:[%s611_s2 + $0x10] sm:$0xff]  ;;  %v179_v17 = vld [vmem:[%s612_s1] sm:$0xff]  ;;  %v246_v21 = vld [vmem:[%s613_s6 + $0x8] sm:$0xff] }
   0x7   :  { %406 = vmatprep.mubr.msk.f32.mxu0 %vm448_vm1, %v447_v0  ;;  %415 = vmatprep.mubr.msk.f32.mxu1 %vm448_vm1, %v447_v0  ;;  %v181_v19 = vld [vmem:[%s612_s1 + $0x10] sm:$0xff]  ;;  %v245_v20 = vld [vmem:[%s613_s6] sm:$0xff]  ;;  %v342_v23 = vld [vmem:[%s614_s7 + $0x8] sm:$0xff] }
   0x8   :  { %407 = vmatmul.mubr.msk.f32.vlgmr.msra.gmra.mxu0 %vm41_vm0, %v36_v4  ;;  %416 = vmatmul.mubr.msk.f32.vlgmr.msra.gmra.mxu1 %vm41_vm0, %v39_v5  ;;  %v341_v22 = vld [vmem:[%s614_s7] sm:$0xff]  ;;  %v244_v47 = vld [vmem:[%s615_s5 + $0x8] sm:$0xff] }
   0x9   :  { %409 = vmatprep.mubr.msk.f32.mxu0 %vm448_vm1, %v447_v0  ;;  %418 = vmatprep.mubr.msk.f32.mxu1 %vm448_vm1, %v447_v0  ;;  %v243_v24 = vld [vmem:[%s615_s5] sm:$0xff] }
   0xa   :  { %441 = vset.pattern.permute.xlu0 %v449_v10  ;;  %442 = vset.pattern.permute.xlu1 %v449_v10 }
   0xb   :  { %168 = vperm.xlu0 %441, %v150_v6   ;;  %158 = vperm.xlu1 %442, %v148_v7  }
   0xc   :  { %410 = vmatmul.mubr.msk.f32.gmra.mxu0 %vm41_vm0, %v37_v8  ;;  %419 = vmatmul.mubr.msk.f32.gmra.mxu1 %vm41_vm0, %v40_v9 }
   0xd   :  { %412 = vmatprep.mubr.msk.f32.mxu0 %vm448_vm1, %v447_v0  ;;  %429 = vmatprep.mubr.msk.f32.mxu1 %vm257_vm2, %v243_v24 }
   0xf   :  { %163 = vperm.xlu0 %441, %v149_v11   ;;  %153 = vperm.xlu1 %442, %v147_v12  }
  0x10   :  { %413 = vmatmul.mubr.msk.f32.gmra.mxu0 %vm41_vm0, %v38_v13 }
  0x13   :  { %187 = vperm.xlu0 %441, %v182_v14   ;;  %192 = vperm.xlu1 %442, %v183_v15  }
  0x17   :  { %197 = vperm.xlu0 %441, %v184_v16   ;;  %205 = vperm.xlu1 %442, %v179_v17  }
  0x1b   :  { %210 = vperm.xlu0 %441, %v180_v18   ;;  %215 = vperm.xlu1 %442, %v181_v19  }
  0x1f   :  { %249 = vperm.xlu0 %441, %v245_v20   ;;  %254 = vperm.xlu1 %442, %v246_v21  }
  0x23   :  { %345 = vperm.xlu0 %441, %v341_v22   ;;  %350 = vperm.xlu1 %442, %v342_v23  }
  0x86   :  { %v169_v25 = vpop.permute.xlu0 %168  ;;  %v159_v31 = vpop.permute.xlu1 %158 }
  0x8a   :  { %v164_v37 = vpop.permute.xlu0 %163  ;;  %v154_v41 = vpop.permute.xlu1 %153 }
  0x8e   :  { %v188_v48 = vpop.permute.xlu0 %187  ;;  %v193_v49 = vpop.permute.xlu1 %192 }
  0x8f   :  { %v200_v52 = vmul.f32 %v188_v48, %v515_v3  ;;  %v201_v53 = vmul.f32 %v193_v49, %v508_v2 }
  0x92   :  { %v198_v50 = vpop.permute.xlu0 %197  ;;  %v206_v51 = vpop.permute.xlu1 %205 }
  0x93   :  { %v202_v55 = vmul.f32 %v198_v50, %v503_v1  ;;  %v218_v57 = vsub.f32 %v206_v51, %v200_v52 }
  0x95   :  { %v221_v61 = vmul.f32 %v218_v57, %v515_v3 }
  0x96   :  { %v211_v54 = vpop.permute.xlu0 %210  ;;  %v216_v58 = vpop.permute.xlu1 %215 }
  0x97   :  { %v219_v56 = vsub.f32 %v211_v54, %v201_v53  ;;  %v220_v62 = vsub.f32 %v216_v58, %v202_v55 }
  0x99   :  { %v222_v60 = vmul.f32 %v219_v56, %v508_v2  ;;  %v223_v4 = vmul.f32 %v220_v62, %v503_v1 }
  0x9a   :  { %v250_v8 = vpop.permute.xlu0 %249  ;;  %v255_v10 = vpop.permute.xlu1 %254 }
  0x9b   :  { %v224_v0 = vadd.f32 %v222_v60, %v221_v61 }
  0x9d   :  { %v225_v6 = vadd.f32 %v224_v0, %v223_v4 }
  0x9e   :  { %v346_v18 = vpop.permute.xlu0 %345  ;;  %v351_v19 = vpop.permute.xlu1 %350 }
  0x9f   :  { %v226_v9 = vrot.slane %v225_v6, 4 }
  0xa1   :  { %v227_v15 = vadd.f32 %v226_v9, %v225_v6 }
  0xa3   :  { %v228_v20 = vrot.slane %v227_v15, 2 }
  0xa5   :  { %v229_v24 = vadd.f32 %v228_v20, %v227_v15 }
  0xc8   :  { %v123_v26 = vpop.f32.mrf.mxu0  ;;  %v138_v27 = vpop.f32.mrf.mxu1 }
  0xc9   :  { %v174_v28 = vadd.f32 %v169_v25, %v138_v27  ;;  %v171_v43 = vadd.f32 %v154_v41, %v123_v26 }
  0xca   :  { %v408_v29 = vpop.f32.mrf.mxu0  ;;  %v417_v30 = vpop.f32.mrf.mxu1 }
  0xcb   :  { %v178_v32 = vmax.f32 %v174_v28, 0.0  ;;  %v175_v46 = vmax.f32 %v171_v43, 0.0  ;;  %v230_v28 = vrot.slane %v229_v24, 1 }
  0xcc   :  { %v128_v33 = vpop.f32.mrf.mxu0  ;;  %v143_v34 = vpop.f32.mrf.mxu1 }
  0xcd   :  { %421 = vmatprep.subr.mxu1 %v178_v32  ;;  %v172_v39 = vadd.f32 %v159_v31, %v128_v33  ;;  %v232_v59 = vmul.f32 %v143_v34, %v143_v34 }
  0xce   :  { %v411_v35 = vpop.f32.mrf.mxu0  ;;  %422 = vmatpush3.msra.mxu1 %v178_v32  ;;  %v420_v36 = vpop.f32.mrf.mxu1  ;;  %v231_v32 = vadd.f32 %v230_v28, %v229_v24 }
  0xcf   :  { %v176_v45 = vmax.f32 %v172_v39, 0.0  ;;  %v234_v63 = vsel %vm233_vm3, %v232_v59, 0.0  ;;  %v364_v36 = vstv %s616_s8 }
  0xd0   :  { %v133_v38 = vpop.f32.mrf.mxu0  ;;  %v235_v5 = vrot.slane %v234_v63, 4 }
  0xd1   :  { %v173_v40 = vadd.f32 %v164_v37, %v133_v38 }
  0xd2   :  { %v414_v42 = vpop.f32.mrf.mxu0  ;;  %v236_v7 = vadd.f32 %v235_v5, %v234_v63 }
  0xd3   :  { %v177_v44 = vmax.f32 %v173_v40, 0.0 }
  0xd4   :  { %v237_v12 = vrot.slane %v236_v7, 2 }
  0xd5   :  { %423 = vmatprep.subr.mxu1 %v177_v44 }
  0xd6   :  { %424 = vmatpush3.msra.mxu1 %v177_v44  ;;  %v238_v3 = vadd.f32 %v237_v12, %v236_v7 }
  0xd7   :  { %425 = vmatprep.subr.mxu1 %v176_v45 }
  0xd8   :  { %426 = vmatpush3.msra.mxu1 %v176_v45  ;;  %v239_v22 = vrot.slane %v238_v3, 1 }
  0xd9   :  { %427 = vmatprep.subr.mxu1 %v175_v46 }
  0xda   :  { %428 = vmatpush3.msra.mxu1 %v175_v46  ;;  %v240_v26 = vadd.f32 %v239_v22, %v238_v3 }
  0xdb   :  { %430 = vmatmul.mubr.msk.f32.vlgmr.msra.gmra.mxu1 %vm257_vm2, %v244_v47 }
  0xdc   :  { %v241_v30 = vmul.f32 0.5, %v240_v26 }
  0xde   :  { %v242_v34 = vadd.f32 %v241_v30, %v231_v32 }
 0x19b   :  { %v431_v11 = vpop.f32.mrf.mxu1 }
 0x19c   :  { %v336_v13 = vadd.f32 %v431_v11, %v255_v10 }
 0x19d   :  { %v330_v14 = vpop.f32.mrf.mxu1 }
 0x19e   :  { %v340_v2 = vmax.f32 %v336_v13, 0.0  ;;  %v331_v16 = vadd.f32 %v330_v14, %v250_v8 }
 0x1a0   :  { %v339_v17 = vmax.f32 %v331_v16, 0.0  ;;  %v354_v21 = vmul.f32 %v351_v19, %v340_v2 }
 0x1a2   :  { %v353_v1 = vmul.f32 %v346_v18, %v339_v17 }
 0x1a4   :  { %v355_v23 = vadd.f32 %v354_v21, %v353_v1 }
 0x1a6   :  { %v356_v25 = vrot.slane %v355_v23, 4 }
 0x1a8   :  { %v357_v27 = vadd.f32 %v356_v25, %v355_v23 }
 0x1aa   :  { %v358_v29 = vrot.slane %v357_v27, 2 }
 0x1ac   :  { %v359_v31 = vadd.f32 %v358_v29, %v357_v27 }
 0x1ae   :  { %v360_v33 = vrot.slane %v359_v31, 1 }
 0x1b0   :  { %v361_v35 = vadd.f32 %v360_v33, %v359_v31 }
 0x1b2   :  { %v362_v37 = vadd.f32 %v361_v35, %v242_v34 }
 0x1b4   :  { %v365_v38 = vadd.f32 %v364_v36, %v362_v37 }
 0x1b6   :  { %v385_v39 = vmul.f32 -1.442695, %v365_v38 }
 0x1b8   :  { %443 = vpow2.f32 %v385_v39 }
 0x1c5   :  { %v444_v40 = vpop.eup %443 }
 0x1c6   :  { %v369_v41 = vadd.f32 1.0, %v444_v40 }
 0x1c8   :  { %445 = vrcp.f32 %v369_v41 }
 0x1d5   :  { %v446_v42 = vpop.eup %445 }
 0x1d6   :  { %v372_v43 = vmul.f32 5.0, %v446_v42 }
 0x1d8   :  { %373 = vst [vmem:[%s617_s9] sm:$0x1] %v372_v43 }

</bundles_post_ra>
